<compile_context>
chip_gen: v7x
topology: tpu7x:2x2x1
jax: 0.10.0
libtpu: 0.0.40
codegen_flags: <defaults>
</compile_context>

<pallas_src>
import jax
import jax.numpy as jnp
from jax.experimental import pallas as pl
from jax.experimental.pallas import tpu as pltpu


def _silu_linear_kernel(xT_ref, w_ref, b_ref, o_ref):
    # xT_ref: (D, M_pad) f32 VMEM  (input, pre-transposed and lane-padded)
    # w_ref : (1, D)     f32 VMEM  (nn.Linear weight layout: (out=1, in=D))
    # b_ref : (1,)       f32 SMEM  (bias scalar)
    # o_ref : (1, M_pad) f32 VMEM  (lane-dense output row)

    # One MXU push replaces the previous multiply + lane-reduce + scatter +
    # sublane-reduce chain; result is already lane-dense.
    v1 = jnp.dot(w_ref[...], xT_ref[...], preferred_element_type=jnp.float32)  # (1, M_pad)
    v1 = v1 + b_ref[0]                        # scalar bias from SMEM (VPU)
    v2 = jax.nn.sigmoid(v1)                   # EUP
    o_ref[...] = (v1 * v2).astype(o_ref.dtype)  # single unmasked lane-dense store


def silu_linear(x, w, b):
    """x: (B, S, D), w: (1, D)  [nn.Linear weight], b: (1,)  ->  (B, S, 1)."""
    B, S, D = x.shape
    M = B * S
    M_pad = ((M + 127) // 128) * 128          # full-lane rows -> unmasked store

    x2d = x.reshape(M, D).astype(jnp.float32)
    # Transpose + pad outside the kernel (tiny XLA ops; ~16 KiB of traffic).
    xT = jnp.pad(x2d.T, ((0, 0), (0, M_pad - M)))      # (D, M_pad)
    w2d = w.reshape(1, D).astype(jnp.float32)           # (1, D)
    b1 = b.reshape(1).astype(jnp.float32)                # (1,)

    cost = pl.CostEstimate(
        flops=2 * M * D + 4 * M,
        transcendentals=M,
        bytes_accessed=(M * D + D + 1 + M) * 4,
    )

    out_row = pl.pallas_call(
        _silu_linear_kernel,
        out_shape=jax.ShapeDtypeStruct((1, M_pad), jnp.float32),
        in_specs=[
            pl.BlockSpec(memory_space=pltpu.MemorySpace.VMEM),   # xT (whole array)
            pl.BlockSpec(memory_space=pltpu.MemorySpace.VMEM),   # w  (whole array)
            pl.BlockSpec(memory_space=pltpu.MemorySpace.SMEM),   # b  (scalar in SMEM)
        ],
        out_specs=pl.BlockSpec(memory_space=pltpu.MemorySpace.VMEM),
        cost_estimate=cost,
    )(xT, w2d, b1)

    # (1, M_pad) row -> drop lane padding -> (B, S, 1); element order is m = b*S + s.
    return out_row[:, :M].reshape(B, S, 1)


if __name__ == "__main__":
    key = jax.random.PRNGKey(0)
    kx, kw, kb = jax.random.split(key, 3)

    B, S, D = 1, 64, 64  # matches x1 = torch.randn(1, 64, 64) and Linear(64, 1)

    x1 = jax.random.normal(kx, (B, S, D), dtype=jnp.float32)
    # Deterministic parameter init (same uniform range convention as torch Linear)
    bound = 1.0 / (D ** 0.5)
    w = jax.random.uniform(kw, (1, D), minval=-bound, maxval=bound, dtype=jnp.float32)
    b = jax.random.uniform(kb, (1,), minval=-bound, maxval=bound, dtype=jnp.float32)

    out = silu_linear(x1, w, b)
    jax.block_until_ready(out)

    # Pure-JAX reference check
    v1 = jnp.einsum("bsd,od->bso", x1, w) + b
    ref = v1 * jax.nn.sigmoid(v1)
    assert out.shape == (B, S, 1)
    assert jnp.allclose(out, ref, atol=1e-5, rtol=1e-5)

    print("KERNEL_OK")
</pallas_src>

<mosaic_0001>
module attributes {stable_mosaic.version = 11 : i64} {
  func.func @_silu_linear_kernel(%arg0: memref<64x128xf32, #tpu.memory_space<vmem>>, %arg1: memref<1x64xf32, #tpu.memory_space<vmem>>, %arg2: memref<1xf32, #tpu.memory_space<smem>>, %arg3: memref<1x128xf32, #tpu.memory_space<vmem>>) attributes {dimension_semantics = [], scalar_prefetch = 0 : i64, scratch_operands = 0 : i64, tpu.core_type = #tpu.core_type<tc>} {
    %c0 = arith.constant 0 : index
    %c0_0 = arith.constant 0 : index
    %0 = vector.load %arg1[%c0, %c0_0] : memref<1x64xf32, #tpu.memory_space<vmem>>, vector<1x64xf32>
    %c0_1 = arith.constant 0 : index
    %c0_2 = arith.constant 0 : index
    %1 = vector.load %arg0[%c0_1, %c0_2] : memref<64x128xf32, #tpu.memory_space<vmem>>, vector<64x128xf32>
    %cst = arith.constant dense<0.000000e+00> : vector<1x128xf32>
    %2 = tpu.matmul %0, %1, %cst {dimension_numbers = #tpu.dot_dimension_numbers<[1], [0], [0], [1], [0, 0, 1, 1], [], []>} : vector<1x64xf32>, vector<64x128xf32>, vector<1x128xf32> -> vector<1x128xf32>
    %c0_3 = arith.constant 0 : index
    %3 = memref.load %arg2[%c0_3] : memref<1xf32, #tpu.memory_space<smem>>
    %4 = vector.broadcast %3 : f32 to vector<1x128xf32>
    %5 = arith.addf %2, %4 : vector<1x128xf32>
    %6 = arith.negf %5 : vector<1x128xf32>
    %7 = math.exp %6 : vector<1x128xf32>
    %cst_4 = arith.constant 1.000000e+00 : f32
    %8 = vector.broadcast %cst_4 : f32 to vector<1x128xf32>
    %9 = arith.addf %8, %7 : vector<1x128xf32>
    %10 = arith.divf %8, %9 : vector<1x128xf32>
    %11 = arith.mulf %5, %10 : vector<1x128xf32>
    %c0_5 = arith.constant 0 : index
    %c0_6 = arith.constant 0 : index
    %12 = vector.load %arg3[%c0_5, %c0_6] : memref<1x128xf32, #tpu.memory_space<vmem>>, vector<1x128xf32>
    tpu.vector_store %arg3[%c0_5, %c0_6], %11 {strides = array<i32>} : memref<1x128xf32, #tpu.memory_space<vmem>>, vector<1x128xf32>,
    return
  }
}

</mosaic_0001>

<bundles_post_ra>
// kernel: tpu_custom_call.1
= control target key start
LH: loop header
LB: loop body
LE: loop exit
PB: predicated region body
PF: predicated region fallthrough
CT: control target
= control target key end

     0   :  { %9 = vsyncpa [#allocation4], 0  ;;  %s296_s0 = inlined_call_operand.hbm [shape: f32[64,128], index: 0, kind: input, shape index: {}]   ;;  %s297_s1 = inlined_call_operand.vmem [shape: f32[1,64], index: 1, kind: input, shape index: {}]   ;;  %s298_s2 = inlined_call_operand.<no memory space> [shape: f32[1], index: 2, kind: input, shape index: {}]   ;;  %s299_s3 = inlined_call_operand.hbm [shape: f32[1,128], index: 3, kind: output, shape index: {}]  }
   0x1   :  { %10 = vsyncpa [#allocation5], 0  ;;  %s239_s12 = smov [#allocation3]   ;;  %s191_s16 = scalar_lea.hbm %s296_s0, 1024 }
   0x2   :  { %s16_s13 = sshll.u32 %s239_s12, 4  ;;  %p192_p0 = scmp.ne.s32.totalorder %s296_s0, %s191_s16  ;;  %s17_s13 = int_to_ptr.vmem [resolvable:$true] %s16_s13 }
   0x3   :  { %p195_p1 = scmp.lt.u32.totalorder %s191_s16, %s296_s0 }
   0x5   :  { %p197_p2 = pnand %p195_p1, %p192_p0 }
   0x7   :  { %200 = shalt.err (!%p197_p2)
}
   0x8   :  { %s201_s21 = scalar_lea.vmem %s17_s13, 1024  ;;  %p206_p4 = scmp.lt.s32.totalorder %s17_s13, %s17_s13 }
   0x9   :  { %p202_p3 = scmp.ne.s32.totalorder %s17_s13, %s201_s21  ;;  %p207_p5 = scmp.lt.s32.totalorder %s201_s21, %s201_s21 }
   0xb   :  { %p208_p6 = por %p207_p5, %p206_p4 }
   0xd   :  { %p209_p7 = pnand %p208_p6, %p202_p3 }
   0xf   :  { %212 = shalt.err (!%p209_p7)
}
  0x10   :  { %s240_s22 = smov 128   ;;  %s241_s23 = smov 8  }
  0x11   :  { %22 = dma.hbm_to_vmem [thread:$0]  %s296_s0, 1024, %s17_s13, [#allocation4], %s240_s22, %s240_s22, %s241_s23  }
  0x12   :  { %235 = dma.done.wait [#allocation4], 1024  }
  0x13   :  { %236 = vsyncadd [#allocation4], 4294966272  ;;  %v242_v0 = vmov 0.0|0.0   ;;  %vm243_vm0 = vmmov 0   ;;  %v244_v1 = vmov 0.0   ;;  %v31_v2 = vld [vmem:[#allocation3] sm:$0xff]  ;;  %v40_v15 = vstv %s298_s2 }
  0x14   :  { %168 = vmatprep.subr.bf16.mxu0 %v242_v0  ;;  %165 = vmatprep.mubr.msk.f32.mxu0 %vm243_vm0, %v244_v1  ;;  %v32_v3 = vld [vmem:[#allocation3 + $0x8] sm:$0xff]  ;;  %v33_v4 = vld [vmem:[#allocation3 + $0x10] sm:$0xff]  ;;  %v34_v6 = vld [vmem:[#allocation3 + $0x18] sm:$0xff]  ;;  %vm41_vm1 = vcmask 523264   ;;  %s245_s29 = smov [#allocation6]  }
  0x15   :  { %v169_v5 = vpack.c.bf16 %v32_v3, %v31_v2  ;;  %v172_v7 = vpack.c.bf16 %v34_v6, %v33_v4  ;;  %v35_v8 = vld [vmem:[#allocation3 + $0x20] sm:$0xff]  ;;  %v36_v9 = vld [vmem:[#allocation3 + $0x28] sm:$0xff]  ;;  %v37_v11 = vld [vmem:[#allocation3 + $0x30] sm:$0xff]  ;;  %s129_s30 = sshll.u32 %s245_s29, 4  ;;  %s130_s30 = int_to_ptr.vmem [resolvable:$true] %s129_s30 }
  0x16   :  { %v175_v10 = vpack.c.bf16 %v36_v9, %v35_v8  ;;  %v38_v12 = vld [vmem:[#allocation3 + $0x38] sm:$0xff]  ;;  %v30_v14 = vld [vmem:[%s297_s1] sm:$0x1]  ;;  %s213_s1 = scalar_lea.vmem %s130_s30, 16  ;;  %s217_s4 = scalar_lea.vmem %s130_s30, 32 }
  0x17   :  { %170 = vmatpush3.bf16.msra.mxu0 %v169_v5  ;;  %v178_v13 = vpack.c.bf16 %v38_v12, %v37_v11  ;;  %p214_p8 = scmp.ne.s32.totalorder %s130_s30, %s213_s1  ;;  %p218_p9 = scmp.lt.s32.totalorder %s130_s30, %s130_s30 }
  0x18   :  { %171 = vmatprep.subr.bf16.mxu0 %v242_v0  ;;  %p219_p10 = scmp.lt.s32.totalorder %s217_s4, %s213_s1 }
  0x1a   :  { %p220_p11 = por %p219_p10, %p218_p9 }
  0x1b   :  { %173 = vmatpush3.bf16.msra.mxu0 %v172_v7 }
  0x1c   :  { %174 = vmatprep.subr.bf16.mxu0 %v242_v0  ;;  %p221_p12 = pnand %p220_p11, %p214_p8 }
  0x1f   :  { %176 = vmatpush3.bf16.msra.mxu0 %v175_v10 }
  0x20   :  { %177 = vmatprep.subr.bf16.mxu0 %v242_v0 }
  0x23   :  { %179 = vmatpush3.bf16.msra.mxu0 %v178_v13 }
  0x26   :  { %166 = vmatmul.mubr.msk.f32.vlgmr.msra.gmra.mrb[0].mxu0 %vm41_vm1, %v30_v14 }
  0xf9   :  { %v111_v16 = vpop.f32.mrb[0].mxu0 }
  0xfa   :  { %v112_v17 = vadd.f32 %v111_v16, %v40_v15  ;;  %v167_v18 = vpop.f32.mrb[1].mxu0 }
  0xfc   :  { %v139_v19 = vmul.f32 -1.442695, %v112_v17 }
  0xfe   :  { %187 = vpow2.f32 %v139_v19 }
 0x108   :  { %v188_v20 = vpop.eup %187 }
 0x109   :  { %v118_v21 = vadd.f32 1.0, %v188_v20 }
 0x10b   :  { %189 = vrcp.f32 %v118_v21 }
 0x115   :  { %v190_v22 = vpop.eup %189 }
 0x116   :  { %v121_v23 = vmul.f32 %v190_v22, %v112_v17 }
 0x118   :  { %122 = vst [vmem:[#allocation6] sm:$0x1] %v121_v23 }
 0x119   :  { %224 = shalt.err (!%p221_p12)
}
 0x11a   :  { %s225_s6 = scalar_lea.hbm %s299_s3, 16 }
 0x11b   :  { %p226_p13 = scmp.ne.s32.totalorder %s299_s3, %s225_s6  ;;  %p229_p0 = scmp.lt.u32.totalorder %s225_s6, %s299_s3 }
 0x11d   :  { %p231_p1 = pnand %p229_p0, %p226_p13 }
 0x11f   :  { %234 = shalt.err (!%p231_p1)
}
 0x120   :  { %132 = dma.vmem_to_hbm [thread:$0]  %s130_s30, 16, %s299_s3, [#allocation5]  }
 0x121   :  { %237 = dma.done.wait [#allocation5], 16  }
 0x122   :  { %238 = vsyncadd [#allocation5], 4294967280 }
 0x123   :  { %136 = vsyncpa [#allocation4], 1 }
 0x124   :  { %137 = vsyncpa [#allocation5], 1 }

</bundles_post_ra>
